<compile_context>
chip_gen: v5e
topology: v5e:2x2
jax: 0.10.0
libtpu: 0.0.40
codegen_flags: <defaults>
</compile_context>

<pallas_src>
import functools

import jax
import jax.numpy as jnp
from jax.experimental import pallas as pl
from jax.experimental.pallas import tpu as pltpu


# ----------------------------------------------------------------------------
# Parameter / mask construction (glue, plain JAX) -- deterministic init.
# ----------------------------------------------------------------------------
def make_made_params(key, in_num, width, depth, out_cats=2):
    """MADE masked complex-linear stack: in_num -> width x depth -> in_num*out_cats.

    Returns a list of (Wr, Wi, br, bi) (float32) with the autoregressive masks
    already multiplied into the weights (mask application is parameter setup,
    not hot-path compute).
    """
    sizes = [in_num] + [width] * depth + [in_num * out_cats]

    # MADE degrees.
    degs = [jnp.arange(1, in_num + 1)]                               # inputs: 1..N
    for _ in range(depth):
        degs.append((jnp.arange(width) % max(in_num - 1, 1)) + 1)    # hidden: 1..N-1 cyclic
    d_out = jnp.concatenate([jnp.arange(1, in_num + 1)] * out_cats)  # outputs: per-site degree
    degs.append(d_out)

    params = []
    for l in range(len(sizes) - 1):
        fan_in, fan_out = sizes[l], sizes[l + 1]
        if l < len(sizes) - 2:
            mask = (degs[l + 1][None, :] >= degs[l][:, None]).astype(jnp.float32)
        else:
            mask = (degs[l + 1][None, :] > degs[l][:, None]).astype(jnp.float32)

        key, k1, k2, k3, k4 = jax.random.split(key, 5)
        scale = 1.0 / jnp.sqrt(jnp.float32(fan_in))
        Wr = jax.random.normal(k1, (fan_in, fan_out), jnp.float32) * scale * mask
        Wi = jax.random.normal(k2, (fan_in, fan_out), jnp.float32) * scale * mask
        br = jax.random.normal(k3, (1, fan_out), jnp.float32) * 0.01
        bi = jax.random.normal(k4, (1, fan_out), jnp.float32) * 0.01
        params.append((Wr, Wi, br, bi))
    return params


def pack_params(params, compute_dtype=jnp.bfloat16):
    """Pack per-layer (Wr, Wi, br, bi) into transposed block-complex form.

    Layer 0 (real input, zero imaginary part):
        W_T = [Wr | Wi]^T              shape [2*fan_out, fan_in]
    Layers l >= 1:
        W_T = [[Wr, Wi], [-Wi, Wr]]^T  shape [2*fan_out, 2*fan_in]
    Bias:  [br | bi]^T                 shape [2*fan_out, 1], kept float32.

    Row order of every activation/output is [real plane | imaginary plane], so
    the complex matmul of a whole layer is a single real MXU dot.
    """
    packed = []
    for l, (Wr, Wi, br, bi) in enumerate(params):
        if l == 0:
            W = jnp.concatenate([Wr, Wi], axis=1)
        else:
            W = jnp.block([[Wr, Wi], [-Wi, Wr]])
        b = jnp.concatenate([br, bi], axis=1)
        packed.append((W.T.astype(compute_dtype), b.T.astype(jnp.float32)))
    return packed


# ----------------------------------------------------------------------------
# Pallas kernel: full MADE MLP forward + per-site logsumexp normalization.
# Activations are feature-major: h[feature, batch_tile].
# ----------------------------------------------------------------------------
def _made_kernel(x_ref, *refs, num_layers, n_sites):
    out_ref = refs[2 * num_layers]

    # Rows [0:F) carry the real plane, rows [F:2F) the imaginary plane.
    h = x_ref[...].astype(jnp.float32)          # [N, TB], real-valued input
    for l in range(num_layers):
        w = refs[2 * l][...]                    # [2*F_out, (2*)F_in]  (compute dtype)
        b = refs[2 * l + 1][...]                # [2*F_out, 1]         (f32)
        z = jnp.dot(w, h.astype(w.dtype), preferred_element_type=jnp.float32) + b
        if l < num_layers - 1:
            # TODO(synk): legacy MADEMLP default activations unavailable here;
            # using split tanh on real/imag planes (elementwise on the block).
            h = jnp.tanh(z)
        else:
            h = z

    # Final rows: [cat0 real | cat1 real | cat0 imag | cat1 imag], n_sites each.
    n = n_sites
    zr = h[: 2 * n, :]
    zi = h[2 * n:, :]
    a0 = 2.0 * zr[:n, :]
    a1 = 2.0 * zr[n:, :]
    m = jnp.maximum(a0, a1)
    lse = m + jnp.log(jnp.exp(a0 - m) + jnp.exp(a1 - m))
    half = 0.5 * lse
    out_r = zr - jnp.concatenate([half, half], axis=0)
    out_ref[...] = jnp.concatenate([out_r, zi], axis=0).astype(out_ref.dtype)


def complex_log_psi_made_mlp(x, packed_params, *, batch_tile=256):
    """Runs the Pallas kernel; returns complex64 log-amplitudes of shape [B, N, 2]."""
    B, N = x.shape
    L = len(packed_params)
    assert packed_params[-1][0].shape[0] == 4 * N

    tb = min(batch_tile, B)
    n_blocks = pl.cdiv(B, tb)
    b_pad = n_blocks * tb
    # Block-shape rule: tile width must equal the (padded) full dim or be a
    # multiple of 128 lanes.
    assert tb == b_pad or tb % 128 == 0

    xt = x.astype(jnp.float32).T                      # [N, B]  batch on lanes
    if b_pad != B:
        xt = jnp.pad(xt, ((0, 0), (0, b_pad - B)))

    in_specs = [pl.BlockSpec((N, tb), lambda i: (0, i))]
    args = [xt]
    for (w, b) in packed_params:
        # Grid-invariant weights/biases: constant block index, fetched once.
        # NOTE: on v7x (64 MiB VMEM) one could additionally single-buffer these
        # grid-invariant refs to shave VMEM; not needed at these sizes.
        in_specs.append(pl.BlockSpec(w.shape, lambda i: (0, 0)))
        in_specs.append(pl.BlockSpec(b.shape, lambda i: (0, 0)))
        args.extend([w, b])

    out = pl.pallas_call(
        functools.partial(_made_kernel, num_layers=L, n_sites=N),
        out_shape=jax.ShapeDtypeStruct((4 * N, b_pad), jnp.float32),
        grid=(n_blocks,),
        in_specs=in_specs,
        out_specs=pl.BlockSpec((4 * N, tb), lambda i: (0, i)),
        compiler_params=pltpu.CompilerParams(
            dimension_semantics=("parallel",),        # lets v7x use both TCs
            vmem_limit_bytes=64 * 1024 * 1024),
    )(*args)

    out = out[:, :B]                                  # drop batch padding
    # TODO(synk): column convention assumes MADE output order [cat0 | cat1]
    # per site; verify against the original torch MADEMLP reshape.
    lp_r = jnp.stack([out[:N].T, out[N:2 * N].T], axis=-1)          # [B, N, 2]
    lp_i = jnp.stack([out[2 * N:3 * N].T, out[3 * N:].T], axis=-1)  # [B, N, 2]
    return lp_r + 1j * lp_i


# ----------------------------------------------------------------------------
# Pure-JAX reference emulating the kernel's numerics (weights/matmul inputs
# rounded to the storage dtype, f32 accumulation and elementwise math).
# ----------------------------------------------------------------------------
def reference(x, packed_params, n_sites):
    h = x.astype(jnp.float32).T
    L = len(packed_params)
    for l, (w, b) in enumerate(packed_params):
        w32 = w.astype(jnp.float32)
        h32 = h.astype(w.dtype).astype(jnp.float32)
        z = w32 @ h32 + b
        h = jnp.tanh(z) if l < L - 1 else z
    N = n_sites
    lp_r = jnp.stack([h[:N].T, h[N:2 * N].T], axis=-1)
    lp_i = jnp.stack([h[2 * N:3 * N].T, h[3 * N:].T], axis=-1)
    lse = jax.scipy.special.logsumexp(2.0 * lp_r, axis=-1, keepdims=True)
    return (lp_r - 0.5 * lse) + 1j * lp_i


if __name__ == "__main__":
    key = jax.random.PRNGKey(0)
    B, N, depth, width = 8, 8, 2, 32

    k_x, k_p = jax.random.split(key)
    # Spin configurations in {-1, +1}.
    x = 2.0 * jax.random.bernoulli(k_x, 0.5, (B, N)).astype(jnp.float32) - 1.0
    raw_params = make_made_params(k_p, in_num=N, width=width, depth=depth, out_cats=2)
    packed = pack_params(raw_params, compute_dtype=jnp.bfloat16)

    log_psis = complex_log_psi_made_mlp(x, packed)
    log_psis = jax.block_until_ready(log_psis)

    ref = reference(x, packed, N)
    assert log_psis.shape == (B, N, 2)
    assert jnp.allclose(log_psis.real, ref.real, atol=1e-2, rtol=1e-2)
    assert jnp.allclose(log_psis.imag, ref.imag, atol=1e-2, rtol=1e-2)

    print("KERNEL_OK")
</pallas_src>

<mosaic_0001>
module attributes {stable_mosaic.version = 11 : i64} {
  func.func @_made_kernel(%arg0: i32, %arg1: memref<8x8xf32, #tpu.memory_space<vmem>>, %arg2: memref<64x8xbf16, #tpu.memory_space<vmem>>, %arg3: memref<64x1xf32, #tpu.memory_space<vmem>>, %arg4: memref<64x64xbf16, #tpu.memory_space<vmem>>, %arg5: memref<64x1xf32, #tpu.memory_space<vmem>>, %arg6: memref<32x64xbf16, #tpu.memory_space<vmem>>, %arg7: memref<32x1xf32, #tpu.memory_space<vmem>>, %arg8: memref<32x8xf32, #tpu.memory_space<vmem>>) attributes {dimension_semantics = [#tpu.dimension_semantics<parallel>], iteration_bounds = array<i64: 1>, scalar_prefetch = 0 : i64, scratch_operands = 0 : i64, tpu.core_type = #tpu.core_type<tc>, window_params = [{transform_indices = @transform_0, window_bounds = array<i64: 8, 8>}, {pipeline_mode = #tpu.pipeline_mode<synchronous>, transform_indices = @transform_1, window_bounds = array<i64: 64, 8>}, {pipeline_mode = #tpu.pipeline_mode<synchronous>, transform_indices = @transform_2, window_bounds = array<i64: 64, 1>}, {pipeline_mode = #tpu.pipeline_mode<synchronous>, transform_indices = @transform_3, window_bounds = array<i64: 64, 64>}, {pipeline_mode = #tpu.pipeline_mode<synchronous>, transform_indices = @transform_4, window_bounds = array<i64: 64, 1>}, {pipeline_mode = #tpu.pipeline_mode<synchronous>, transform_indices = @transform_5, window_bounds = array<i64: 32, 64>}, {pipeline_mode = #tpu.pipeline_mode<synchronous>, transform_indices = @transform_6, window_bounds = array<i64: 32, 1>}, {transform_indices = @transform_7, window_bounds = array<i64: 32, 8>}]} {
    %c0 = arith.constant 0 : index
    %c0_0 = arith.constant 0 : index
    %0 = vector.load %arg1[%c0, %c0_0] : memref<8x8xf32, #tpu.memory_space<vmem>>, vector<8x8xf32>
    %c0_1 = arith.constant 0 : index
    %c0_2 = arith.constant 0 : index
    %1 = vector.load %arg2[%c0_1, %c0_2] : memref<64x8xbf16, #tpu.memory_space<vmem>>, vector<64x8xbf16>
    %c0_3 = arith.constant 0 : index
    %c0_4 = arith.constant 0 : index
    %2 = vector.load %arg3[%c0_3, %c0_4] : memref<64x1xf32, #tpu.memory_space<vmem>>, vector<64x1xf32>
    %3 = arith.truncf %0 : vector<8x8xf32> to vector<8x8xbf16>
    %cst = arith.constant dense<0.000000e+00> : vector<64x8xf32>
    %4 = tpu.matmul %1, %3, %cst {dimension_numbers = #tpu.dot_dimension_numbers<[1], [0], [0], [1], [0, 0, 1, 1], [], []>} : vector<64x8xbf16>, vector<8x8xbf16>, vector<64x8xf32> -> vector<64x8xf32>
    %5 = vector.broadcast %2 : vector<64x1xf32> to vector<64x8xf32>
    %6 = arith.addf %4, %5 : vector<64x8xf32>
    %7 = math.tanh %6 : vector<64x8xf32>
    %c0_5 = arith.constant 0 : index
    %c0_6 = arith.constant 0 : index
    %8 = vector.load %arg4[%c0_5, %c0_6] : memref<64x64xbf16, #tpu.memory_space<vmem>>, vector<64x64xbf16>
    %c0_7 = arith.constant 0 : index
    %c0_8 = arith.constant 0 : index
    %9 = vector.load %arg5[%c0_7, %c0_8] : memref<64x1xf32, #tpu.memory_space<vmem>>, vector<64x1xf32>
    %10 = arith.truncf %7 : vector<64x8xf32> to vector<64x8xbf16>
    %cst_9 = arith.constant dense<0.000000e+00> : vector<64x8xf32>
    %11 = tpu.matmul %8, %10, %cst_9 {dimension_numbers = #tpu.dot_dimension_numbers<[1], [0], [0], [1], [0, 0, 1, 1], [], []>} : vector<64x64xbf16>, vector<64x8xbf16>, vector<64x8xf32> -> vector<64x8xf32>
    %12 = vector.broadcast %9 : vector<64x1xf32> to vector<64x8xf32>
    %13 = arith.addf %11, %12 : vector<64x8xf32>
    %14 = math.tanh %13 : vector<64x8xf32>
    %c0_10 = arith.constant 0 : index
    %c0_11 = arith.constant 0 : index
    %15 = vector.load %arg6[%c0_10, %c0_11] : memref<32x64xbf16, #tpu.memory_space<vmem>>, vector<32x64xbf16>
    %c0_12 = arith.constant 0 : index
    %c0_13 = arith.constant 0 : index
    %16 = vector.load %arg7[%c0_12, %c0_13] : memref<32x1xf32, #tpu.memory_space<vmem>>, vector<32x1xf32>
    %17 = arith.truncf %14 : vector<64x8xf32> to vector<64x8xbf16>
    %cst_14 = arith.constant dense<0.000000e+00> : vector<32x8xf32>
    %18 = tpu.matmul %15, %17, %cst_14 {dimension_numbers = #tpu.dot_dimension_numbers<[1], [0], [0], [1], [0, 0, 1, 1], [], []>} : vector<32x64xbf16>, vector<64x8xbf16>, vector<32x8xf32> -> vector<32x8xf32>
    %19 = vector.broadcast %16 : vector<32x1xf32> to vector<32x8xf32>
    %20 = arith.addf %18, %19 : vector<32x8xf32>
    %21 = vector.extract_strided_slice %20 {offsets = [0, 0], sizes = [16, 8], strides = [1, 1]} : vector<32x8xf32> to vector<16x8xf32>
    %22 = vector.extract_strided_slice %20 {offsets = [16, 0], sizes = [16, 8], strides = [1, 1]} : vector<32x8xf32> to vector<16x8xf32>
    %23 = vector.extract_strided_slice %21 {offsets = [0, 0], sizes = [8, 8], strides = [1, 1]} : vector<16x8xf32> to vector<8x8xf32>
    %cst_15 = arith.constant 2.000000e+00 : f32
    %24 = vector.broadcast %cst_15 : f32 to vector<8x8xf32>
    %25 = arith.mulf %24, %23 : vector<8x8xf32>
    %26 = vector.extract_strided_slice %21 {offsets = [8, 0], sizes = [8, 8], strides = [1, 1]} : vector<16x8xf32> to vector<8x8xf32>
    %cst_16 = arith.constant 2.000000e+00 : f32
    %27 = vector.broadcast %cst_16 : f32 to vector<8x8xf32>
    %28 = arith.mulf %27, %26 : vector<8x8xf32>
    %29 = arith.maximumf %25, %28 : vector<8x8xf32>
    %30 = arith.subf %25, %29 : vector<8x8xf32>
    %31 = math.exp %30 : vector<8x8xf32>
    %32 = arith.subf %28, %29 : vector<8x8xf32>
    %33 = math.exp %32 : vector<8x8xf32>
    %34 = arith.addf %31, %33 : vector<8x8xf32>
    %35 = math.log %34 : vector<8x8xf32>
    %36 = arith.addf %29, %35 : vector<8x8xf32>
    %cst_17 = arith.constant 5.000000e-01 : f32
    %37 = vector.broadcast %cst_17 : f32 to vector<8x8xf32>
    %38 = arith.mulf %37, %36 : vector<8x8xf32>
    %39 = tpu.concatenate %38, %38 in 0 : vector<8x8xf32>, vector<8x8xf32> -> vector<16x8xf32>
    %40 = arith.subf %21, %39 : vector<16x8xf32>
    %41 = tpu.concatenate %40, %22 in 0 : vector<16x8xf32>, vector<16x8xf32> -> vector<32x8xf32>
    %c0_18 = arith.constant 0 : index
    %c0_19 = arith.constant 0 : index
    %42 = vector.load %arg8[%c0_18, %c0_19] : memref<32x8xf32, #tpu.memory_space<vmem>>, vector<32x8xf32>
    tpu.vector_store %arg8[%c0_18, %c0_19], %41 {strides = array<i32>} : memref<32x8xf32, #tpu.memory_space<vmem>>, vector<32x8xf32>,
    return
  }
  func.func @transform_0(%arg0: i32) -> (i32, i32) {
    %c0_i32 = arith.constant 0 : i32
    %c0_i32_0 = arith.constant 0 : i32
    return %c0_i32, %arg0 : i32, i32
  }
  func.func @transform_1(%arg0: i32) -> (i32, i32) {
    %c0_i32 = arith.constant 0 : i32
    %c0_i32_0 = arith.constant 0 : i32
    %c0_i32_1 = arith.constant 0 : i32
    return %c0_i32, %c0_i32_0 : i32, i32
  }
  func.func @transform_2(%arg0: i32) -> (i32, i32) {
    %c0_i32 = arith.constant 0 : i32
    %c0_i32_0 = arith.constant 0 : i32
    %c0_i32_1 = arith.constant 0 : i32
    return %c0_i32, %c0_i32_0 : i32, i32
  }
  func.func @transform_3(%arg0: i32) -> (i32, i32) {
    %c0_i32 = arith.constant 0 : i32
    %c0_i32_0 = arith.constant 0 : i32
    %c0_i32_1 = arith.constant 0 : i32
    return %c0_i32, %c0_i32_0 : i32, i32
  }
  func.func @transform_4(%arg0: i32) -> (i32, i32) {
    %c0_i32 = arith.constant 0 : i32
    %c0_i32_0 = arith.constant 0 : i32
    %c0_i32_1 = arith.constant 0 : i32
    return %c0_i32, %c0_i32_0 : i32, i32
  }
  func.func @transform_5(%arg0: i32) -> (i32, i32) {
    %c0_i32 = arith.constant 0 : i32
    %c0_i32_0 = arith.constant 0 : i32
    %c0_i32_1 = arith.constant 0 : i32
    return %c0_i32, %c0_i32_0 : i32, i32
  }
  func.func @transform_6(%arg0: i32) -> (i32, i32) {
    %c0_i32 = arith.constant 0 : i32
    %c0_i32_0 = arith.constant 0 : i32
    %c0_i32_1 = arith.constant 0 : i32
    return %c0_i32, %c0_i32_0 : i32, i32
  }
  func.func @transform_7(%arg0: i32) -> (i32, i32) {
    %c0_i32 = arith.constant 0 : i32
    %c0_i32_0 = arith.constant 0 : i32
    return %c0_i32, %arg0 : i32, i32
  }
}

</mosaic_0001>

<bundles_post_ra>
// kernel: tpu_custom_call.1
= control target key start
LH: loop header
LB: loop body
LE: loop exit
PB: predicated region body
PF: predicated region fallthrough
CT: control target
= control target key end

     0   :  { %v487_v0 = vmov 0   ;;  %vm118_vm0 = vcmask 1043456   ;;  %vm105_vm1 = vcmask 64512   ;;  %vm239_vm2 = vcmask 523264   ;;  %s647_s2 = inlined_call_operand.vmem [shape: f32[64,1], index: 2, kind: input, shape index: {}]   ;;  %s648_s0 = inlined_call_operand.vmem [shape: f32[8,8], index: 0, kind: input, shape index: {}]   ;;  %s649_s1 = inlined_call_operand.vmem [shape: bf16[64,8], index: 1, kind: input, shape index: {}]   ;;  %s650_s4 = inlined_call_operand.vmem [shape: f32[64,1], index: 4, kind: input, shape index: {}]   ;;  %s651_s6 = inlined_call_operand.vmem [shape: f32[32,1], index: 6, kind: input, shape index: {}]   ;;  %s652_s3 = inlined_call_operand.vmem [shape: bf16[64,64], index: 3, kind: input, shape index: {}]   ;;  %s653_s5 = inlined_call_operand.vmem [shape: bf16[32,64], index: 5, kind: input, shape index: {}]   ;;  %s654_s7 = inlined_call_operand.vmem [shape: f32[32,8], index: 7, kind: output, shape index: {}]  }
   0x1   :  { %446 = vset.pattern.permute.xlu0 %v487_v0  ;;  %447 = vset.pattern.permute.xlu1 %v487_v0  ;;  %v42_v1 = vld [vmem:[%s647_s2 + $0x30] sm:$0xff]  ;;  %v40_v2 = vld [vmem:[%s647_s2 + $0x20] sm:$0xff]  ;;  %v433_v7 = vld [vmem:[%s649_s1 + $0x18] sm:$0xff] }
   0x2   :  { %v27_v3 = vld [vmem:[%s648_s0] sm:$0xff]  ;;  %77 = vperm.xlu0 %446, %v42_v1   ;;  %67 = vperm.xlu1 %447, %v40_v2   ;;  %v38_v8 = vld [vmem:[%s647_s2 + $0x10] sm:$0xff]  ;;  %v43_v9 = vld [vmem:[%s647_s2 + $0x38] sm:$0xff] }
   0x3   :  { %v44_v4 = vpack.c.bf16 %v27_v3, %v27_v3  ;;  %448 = vset.pattern.permute.xlu2 %v487_v0  ;;  %v430_v6 = vld [vmem:[%s649_s1] sm:$0xff]  ;;  %v41_v10 = vld [vmem:[%s647_s2 + $0x28] sm:$0xff]  ;;  %v39_v11 = vld [vmem:[%s647_s2 + $0x18] sm:$0xff] }
   0x4   :  { %57 = vperm.xlu2 %448, %v38_v8   ;;  %v36_v12 = vld [vmem:[%s647_s2] sm:$0xff]  ;;  %v37_v13 = vld [vmem:[%s647_s2 + $0x8] sm:$0xff]  ;;  %v173_v14 = vld [vmem:[%s650_s4 + $0x30] sm:$0xff] }
   0x5   :  { %v120_v5 = vsel %vm118_vm0, %v44_v4, 0  ;;  %v431_v15 = vld [vmem:[%s649_s1 + $0x8] sm:$0xff]  ;;  %v174_v16 = vld [vmem:[%s650_s4 + $0x38] sm:$0xff]  ;;  %v171_v17 = vld [vmem:[%s650_s4 + $0x20] sm:$0xff] }
   0x6   :  { %129 = vmatpush.bf16.msra.mxu0 %v120_v5  ;;  %440 = vmatpush.bf16.msra.mxu1 %v120_v5  ;;  %v172_v18 = vld [vmem:[%s650_s4 + $0x28] sm:$0xff]  ;;  %v169_v19 = vld [vmem:[%s650_s4 + $0x10] sm:$0xff]  ;;  %v170_v20 = vld [vmem:[%s650_s4 + $0x18] sm:$0xff] }
   0x7   :  { %v167_v21 = vld [vmem:[%s650_s4] sm:$0xff]  ;;  %v432_v22 = vld [vmem:[%s649_s1 + $0x10] sm:$0xff]  ;;  %v168_v23 = vld [vmem:[%s650_s4 + $0x8] sm:$0xff] }
   0x8   :  { %v293_v24 = vld [vmem:[%s651_s6] sm:$0xff]  ;;  %v294_v25 = vld [vmem:[%s651_s6 + $0x8] sm:$0xff]  ;;  %v295_v26 = vld [vmem:[%s651_s6 + $0x10] sm:$0xff] }
   0x9   :  { %396 = vmatmul.msk.bf16.vlgmr.msra.gmra.mxu0 %vm105_vm1, %v430_v6  ;;  %399 = vmatmul.msk.bf16.vlgmr.msra.gmra.mxu1 %vm105_vm1, %v433_v7  ;;  %v296_v27 = vld [vmem:[%s651_s6 + $0x18] sm:$0xff]  ;;  %v434_v0 = vld [vmem:[%s652_s3] sm:$0xff]  ;;  %v435_v1 = vld [vmem:[%s652_s3 + $0x8] sm:$0xff] }
   0xa   :  { %82 = vperm.xlu0 %446, %v43_v9   ;;  %72 = vperm.xlu1 %447, %v41_v10   ;;  %v436_v2 = vld [vmem:[%s652_s3 + $0x10] sm:$0xff]  ;;  %v437_v3 = vld [vmem:[%s652_s3 + $0x18] sm:$0xff] }
   0xc   :  { %62 = vperm.xlu2 %448, %v39_v11  }
  0x12   :  { %47 = vperm.xlu0 %446, %v36_v12   ;;  %52 = vperm.xlu1 %447, %v37_v13  }
  0x14   :  { %211 = vperm.xlu2 %448, %v173_v14  }
  0x19   :  { %397 = vmatmul.msk.bf16.gmra.mxu0 %vm105_vm1, %v431_v15 }
  0x1a   :  { %216 = vperm.xlu0 %446, %v174_v16   ;;  %201 = vperm.xlu1 %447, %v171_v17  }
  0x1c   :  { %206 = vperm.xlu2 %448, %v172_v18  }
  0x22   :  { %191 = vperm.xlu0 %446, %v169_v19   ;;  %196 = vperm.xlu1 %447, %v170_v20  }
  0x24   :  { %181 = vperm.xlu2 %448, %v167_v21  }
  0x29   :  { %398 = vmatmul.msk.bf16.gmra.mxu0 %vm105_vm1, %v432_v22 }
  0x2a   :  { %186 = vperm.xlu0 %446, %v168_v23   ;;  %303 = vperm.xlu1 %447, %v293_v24  }
  0x2c   :  { %308 = vperm.xlu2 %448, %v294_v25  }
  0x32   :  { %313 = vperm.xlu0 %446, %v295_v26   ;;  %318 = vperm.xlu1 %447, %v296_v27  }
  0x5e   :  { %v58_v42 = vpop.permute.xlu2 %57 }
  0x66   :  { %v63_v46 = vpop.permute.xlu2 %62 }
  0x6e   :  { %v212_v9 = vpop.permute.xlu2 %211 }
  0x74   :  { %v78_v28 = vpop.permute.xlu0 %77  ;;  %v68_v40 = vpop.permute.xlu1 %67 }
  0x76   :  { %v207_v15 = vpop.permute.xlu2 %206 }
  0x7c   :  { %v83_v32 = vpop.permute.xlu0 %82  ;;  %v73_v44 = vpop.permute.xlu1 %72 }
  0x84   :  { %v48_v51 = vpop.permute.xlu0 %47  ;;  %v53_v52 = vpop.permute.xlu1 %52 }
  0x86   :  { %v131_v29 = vpop.f32.mrf.mxu0  ;;  %v146_v30 = vpop.f32.mrf.mxu1 }
  0x87   :  { %v147_v31 = vadd.f32 %v146_v30, %v78_v28  ;;  %v132_v54 = vadd.f32 %v131_v29, %v48_v51  ;;  %v182_v28 = vpop.permute.xlu2 %181 }
  0x89   :  { %449 = vtanh.f32 %v147_v31 }
  0x8c   :  { %v217_v8 = vpop.permute.xlu0 %216  ;;  %v202_v11 = vpop.permute.xlu1 %201 }
  0x8e   :  { %v133_v33 = vpop.f32.mrf.mxu0  ;;  %v148_v34 = vpop.f32.mrf.mxu1 }
  0x8f   :  { %v149_v35 = vadd.f32 %v148_v34, %v83_v32  ;;  %v450_v36 = vpop.eup %449  ;;  %v134_v53 = vadd.f32 %v133_v33, %v53_v52 }
  0x91   :  { %451 = vtanh.f32 %v149_v35 }
  0x94   :  { %v192_v13 = vpop.permute.xlu0 %191  ;;  %v197_v20 = vpop.permute.xlu1 %196 }
  0x96   :  { %v136_v37 = vpop.f32.mrf.mxu0 }
  0x97   :  { %v452_v38 = vpop.eup %451  ;;  %v137_v50 = vadd.f32 %v136_v37, %v58_v42 }
  0x98   :  { %v178_v39 = vpack.c.bf16 %v452_v38, %v450_v36 }
  0x9a   :  { %256 = vmatpush.bf16.msrb.mxu1 %v178_v39  ;;  %441 = vmatpush.bf16.msra.mxu3 %v178_v39 }
  0x9c   :  { %v187_v25 = vpop.permute.xlu0 %186 }
  0x9e   :  { %v138_v41 = vpop.f32.mrf.mxu0 }
  0x9f   :  { %v139_v48 = vadd.f32 %v138_v41, %v63_v46  ;;  %v439_v41 = vld [vmem:[%s653_s5 + $0x8] sm:$0xff] }
  0xa6   :  { %v141_v43 = vpop.f32.mrf.mxu0 }
  0xa7   :  { %v142_v45 = vadd.f32 %v141_v43, %v68_v40  ;;  %v438_v40 = vld [vmem:[%s653_s5] sm:$0xff]  ;;  %v304_v43 = vpop.permute.xlu1 %303 }
  0xa9   :  { %453 = vtanh.f32 %v142_v45  ;;  %v309_v45 = vpop.permute.xlu2 %308 }
  0xae   :  { %v143_v47 = vpop.f32.mrf.mxu0 }
  0xaf   :  { %v144_v49 = vadd.f32 %v143_v47, %v73_v44  ;;  %v454_v55 = vpop.eup %453 }
  0xb1   :  { %455 = vtanh.f32 %v144_v49 }
  0xb2   :  { %457 = vtanh.f32 %v139_v48 }
  0xb3   :  { %459 = vtanh.f32 %v137_v50 }
  0xb4   :  { %461 = vtanh.f32 %v134_v53  ;;  %v314_v53 = vpop.permute.xlu0 %313 }
  0xb5   :  { %463 = vtanh.f32 %v132_v54 }
  0xb7   :  { %v456_v56 = vpop.eup %455 }
  0xb8   :  { %v177_v57 = vpack.c.bf16 %v456_v56, %v454_v55  ;;  %v458_v58 = vpop.eup %457 }
  0xb9   :  { %v460_v59 = vpop.eup %459 }
  0xba   :  { %257 = vmatpush.bf16.msrb.mxu1 %v177_v57  ;;  %442 = vmatpush.bf16.msra.mxu3 %v177_v57  ;;  %v176_v60 = vpack.c.bf16 %v458_v58, %v460_v59  ;;  %v462_v61 = vpop.eup %461  ;;  %v319_v58 = vpop.permute.xlu1 %318 }
  0xbb   :  { %v464_v62 = vpop.eup %463 }
  0xbc   :  { %v175_v63 = vpack.c.bf16 %v462_v61, %v464_v62 }
  0xbe   :  { %258 = vmatpush.bf16.msrb.mxu1 %v176_v60  ;;  %443 = vmatpush.bf16.msra.mxu3 %v176_v60 }
  0xc2   :  { %259 = vmatpush.bf16.msrb.mxu1 %v175_v63  ;;  %444 = vmatpush.bf16.msra.mxu3 %v175_v63 }
  0xc5   :  { %416 = vmatmul.msk.bf16.vlgmr.msrb.gmra.mxu1 %vm239_vm2, %v434_v0  ;;  %417 = vmatmul.msk.bf16.vlgmr.msra.gmra.mxu3 %vm239_vm2, %v435_v1 }
  0xd5   :  { %418 = vmatmul.msk.bf16.gmra.mxu3 %vm239_vm2, %v436_v2 }
  0xe5   :  { %419 = vmatmul.msk.bf16.gmra.mxu3 %vm239_vm2, %v437_v3 }
 0x142   :  { %v261_v12 = vpop.f32.mrf.mxu1 }
 0x143   :  { %v262_v31 = vadd.f32 %v261_v12, %v182_v28 }
 0x148   :  { %v266_v4 = vpop.f32.mrf.mxu3 }
 0x149   :  { %v267_v23 = vadd.f32 %v266_v4, %v192_v13 }
 0x14a   :  { %v263_v22 = vpop.f32.mrf.mxu1 }
 0x14b   :  { %v264_v27 = vadd.f32 %v263_v22, %v187_v25 }
 0x150   :  { %v268_v5 = vpop.f32.mrf.mxu3 }
 0x151   :  { %v269_v21 = vadd.f32 %v268_v5, %v197_v20 }
 0x158   :  { %v271_v6 = vpop.f32.mrf.mxu3 }
 0x159   :  { %v272_v19 = vadd.f32 %v271_v6, %v202_v11 }
 0x160   :  { %v273_v7 = vpop.f32.mrf.mxu3 }
 0x161   :  { %v274_v17 = vadd.f32 %v273_v7, %v207_v15 }
 0x168   :  { %v276_v10 = vpop.f32.mrf.mxu3 }
 0x169   :  { %v277_v14 = vadd.f32 %v276_v10, %v212_v9 }
 0x16b   :  { %465 = vtanh.f32 %v277_v14 }
 0x170   :  { %v278_v16 = vpop.f32.mrf.mxu3 }
 0x171   :  { %v279_v18 = vadd.f32 %v278_v16, %v217_v8  ;;  %v466_v24 = vpop.eup %465 }
 0x173   :  { %467 = vtanh.f32 %v279_v18 }
 0x174   :  { %469 = vtanh.f32 %v274_v17 }
 0x175   :  { %471 = vtanh.f32 %v272_v19 }
 0x176   :  { %473 = vtanh.f32 %v269_v21 }
 0x177   :  { %475 = vtanh.f32 %v267_v23 }
 0x178   :  { %477 = vtanh.f32 %v264_v27 }
 0x179   :  { %v468_v26 = vpop.eup %467  ;;  %479 = vtanh.f32 %v262_v31 }
 0x17a   :  { %v300_v29 = vpack.c.bf16 %v468_v26, %v466_v24  ;;  %v470_v30 = vpop.eup %469 }
 0x17b   :  { %v472_v32 = vpop.eup %471 }
 0x17c   :  { %341 = vmatpush.bf16.msra.mxu2 %v300_v29  ;;  %v299_v33 = vpack.c.bf16 %v470_v30, %v472_v32  ;;  %v474_v34 = vpop.eup %473 }
 0x17d   :  { %v476_v35 = vpop.eup %475 }
 0x17e   :  { %v298_v36 = vpack.c.bf16 %v474_v34, %v476_v35  ;;  %v478_v37 = vpop.eup %477 }
 0x17f   :  { %v480_v38 = vpop.eup %479 }
 0x180   :  { %342 = vmatpush.bf16.msra.mxu2 %v299_v33  ;;  %v297_v39 = vpack.c.bf16 %v478_v37, %v480_v38 }
 0x184   :  { %343 = vmatpush.bf16.msra.mxu2 %v298_v36 }
 0x188   :  { %344 = vmatpush.bf16.msra.mxu2 %v297_v39 }
 0x18b   :  { %428 = vmatmul.msk.bf16.vlgmr.msra.gmra.mxu2 %vm239_vm2, %v438_v40 }
 0x19b   :  { %429 = vmatmul.msk.bf16.gmra.mxu2 %vm239_vm2, %v439_v41 }
 0x20e   :  { %v346_v42 = vpop.f32.mrf.mxu2 }
 0x20f   :  { %v347_v44 = vadd.f32 %v346_v42, %v304_v43 }
 0x211   :  { %v356_v48 = vmul.f32 2.0, %v347_v44 }
 0x216   :  { %v348_v46 = vpop.f32.mrf.mxu2 }
 0x217   :  { %v349_v47 = vadd.f32 %v348_v46, %v309_v45 }
 0x219   :  { %v357_v49 = vmul.f32 2.0, %v349_v47 }
 0x21b   :  { %v358_v50 = vmax.f32 %v356_v48, %v357_v49 }
 0x21d   :  { %v359_v51 = vsub.f32 %v356_v48, %v358_v50  ;;  %v362_v52 = vsub.f32 %v357_v49, %v358_v50 }
 0x21e   :  { %v351_v54 = vpop.f32.mrf.mxu2 }
 0x21f   :  { %v360_v55 = vmul.f32 1.442695, %v359_v51  ;;  %v363_v56 = vmul.f32 1.442695, %v362_v52  ;;  %v352_v57 = vadd.f32 %v351_v54, %v314_v53 }
 0x221   :  { %481 = vpow2.f32 %v360_v55  ;;  %374 = vst.msk [vmem:[%s654_s7 + $0x10] sm:$0xff] %vm105_vm1, %v352_v57 }
 0x222   :  { %483 = vpow2.f32 %v363_v56 }
 0x226   :  { %v353_v59 = vpop.f32.mrf.mxu2 }
 0x227   :  { %v482_v60 = vpop.eup %481  ;;  %v354_v61 = vadd.f32 %v353_v59, %v319_v58 }
 0x228   :  { %v484_v62 = vpop.eup %483 }
 0x229   :  { %v365_v63 = vadd.f32 %v484_v62, %v482_v60  ;;  %375 = vst.msk [vmem:[%s654_s7 + $0x18] sm:$0xff] %vm105_vm1, %v354_v61 }
 0x22b   :  { %485 = vlog2.f32 %v365_v63 }
 0x231   :  { %v486_v0 = vpop.eup %485 }
 0x232   :  { %v367_v1 = vmul.f32 0.6931472, %v486_v0 }
 0x234   :  { %v368_v2 = vadd.f32 %v367_v1, %v358_v50 }
 0x236   :  { %v369_v3 = vmul.f32 0.5, %v368_v2 }
 0x238   :  { %v370_v4 = vsub.f32 %v347_v44, %v369_v3  ;;  %v371_v5 = vsub.f32 %v349_v47, %v369_v3 }
 0x23a   :  { %372 = vst.msk [vmem:[%s654_s7] sm:$0xff] %vm105_vm1, %v370_v4 }
 0x23b   :  { %373 = vst.msk [vmem:[%s654_s7 + $0x8] sm:$0xff] %vm105_vm1, %v371_v5 }

</bundles_post_ra>
